<compile_context>
chip_gen: v5e
topology: v5e:2x2
jax: 0.10.0
libtpu: 0.0.40
codegen_flags: <defaults>
</compile_context>

<pallas_src>
import jax
import jax.numpy as jnp
from jax import lax
from jax.experimental import pallas as pl
from jax.experimental.pallas import tpu as pltpu


def _round_up(v, m):
    return ((v + m - 1) // m) * m


def _newton_recip(x):
    """EUP approximate reciprocal refined by one Newton step."""
    inv = pl.reciprocal(x, approx=True)
    return inv * (2.0 - x * inv)


def _vmem_limit_bytes(per_step_bytes):
    """Generation-aware scoped-VMEM limit (double-buffered per-step + headroom)."""
    try:
        cap = int(pltpu.get_tpu_info().vmem_capacity_bytes)
    except Exception:  # pragma: no cover - non-TPU / old runtime fallback
        cap = 64 << 20
    budget = (cap * 3) // 4                      # leave compiler headroom
    need = 2 * int(per_step_bytes) + (4 << 20)   # 2x for double buffering
    return int(max(min(need, budget), 16 << 20))


def hypergraph_conv(x, edge_index, h_hat_full, edge_weights, w_lin, b_lin,
                    *, tile_n=512, tile_e=512, compute_dtype=jnp.bfloat16):
    """HypergraphConv forward pass (eval mode)."""
    # TODO(synk): training-mode dropout (p=0.5) omitted; eval-mode identity used.
    N, in_dim = x.shape
    E = edge_index.shape[1]
    out_dim = w_lin.shape[0]

    f32 = jnp.float32
    h_bytes = jnp.dtype(compute_dtype).itemsize

    # One spare input column carries the affine "1" (bias folded into the MXU);
    # one spare output column carries the degree sums (b in pass 1, dh in pass 2).
    in_pad = _round_up(in_dim + 1, 128)
    out_pad = _round_up(out_dim + 1, 128)
    ones_col = in_dim
    spare_col = out_dim

    tile_n = max(128, min(_round_up(tile_n, 128), _round_up(N, 128)))
    tile_e = max(128, min(_round_up(tile_e, 128), _round_up(E, 128)))
    n_pad = _round_up(N, tile_n)
    e_pad = _round_up(E, tile_e)
    n_tiles = n_pad // tile_n
    e_tiles = e_pad // tile_e

    # ---- host-side padded / masked operands (no (N, E) transpose) -----------
    # Padded edges: src = tgt = -1, ew = 0 -> never incident, contribute 0.
    # Padded nodes: no incident edges -> rows of H_w are zero.
    src = jnp.full((e_pad,), -1, jnp.int32).at[:E].set(edge_index[0].astype(jnp.int32))
    tgt = jnp.full((e_pad,), -1, jnp.int32).at[:E].set(edge_index[1].astype(jnp.int32))
    ew = jnp.zeros((e_pad,), f32).at[:E].set(edge_weights[:E].astype(f32))
    src_row = src.reshape(1, e_pad)
    tgt_row = tgt.reshape(1, e_pad)
    ew_col = ew.reshape(e_pad, 1)               # only read once per E-tile (finalize)

    h_hat = jnp.zeros((n_pad, e_pad), compute_dtype).at[:N, :E].set(
        h_hat_full[:N, :E].astype(compute_dtype))

    x_p = jnp.zeros((n_pad, in_pad), f32).at[:N, :in_dim].set(x.astype(f32))
    x_p = x_p.at[:, ones_col].set(1.0)          # affine "ones" column

    # Augmented linear weights: [W^T ; bias] plus a 1 routed to the spare output
    # column so t1's spare column accumulates the edge degree via the MXU.
    w_aug = jnp.zeros((in_pad, out_pad), f32)
    w_aug = w_aug.at[:in_dim, :out_dim].set(w_lin.T.astype(f32))
    w_aug = w_aug.at[ones_col, :out_dim].set(b_lin.astype(f32))
    w_aug = w_aug.at[ones_col, spare_col].set(1.0)

    # ---------------- pass 1: t1s[e, :] = (ew/b)[e] * sum_n H_w[n, e] * x_lin[n, :]
    def reduce_kernel(src_ref, tgt_ref, ew_ref, x_ref, hhat_ref, w_ref, t1s_ref):
        n_step = pl.program_id(1)

        @pl.when(n_step == 0)
        def _init():
            t1s_ref[...] = jnp.zeros_like(t1s_ref)

        # Build the H_w tile in its natural (TILE_N, TILE_E) orientation.
        node_ids = n_step * tile_n + lax.broadcasted_iota(
            jnp.int32, (tile_n, tile_e), 0)
        incident = jnp.logical_or(node_ids == src_ref[...],
                                  node_ids == tgt_ref[...])
        h_w = jnp.where(incident, jnp.maximum(hhat_ref[...], 0), 0.0)
        h_w = h_w.astype(compute_dtype)

        # x_lin = x @ W + bias, with a "1" in the spare column (affine trick).
        x_lin = jnp.dot(x_ref[...], w_ref[...], preferred_element_type=f32)

        # t1 += H_w^T @ x_lin, contracting the node axis (dim 0 of both) so the
        # streamed tile needs no transpose.  Spare column accumulates bdeg.
        t1s_ref[...] += lax.dot_general(
            h_w, x_lin.astype(compute_dtype),
            dimension_numbers=(((0,), (0,)), ((), ())),
            preferred_element_type=f32)

        @pl.when(n_step == pl.num_programs(1) - 1)
        def _finalize():
            t1 = t1s_ref[...]                                  # (tile_e, out_pad)
            b = t1[:, spare_col:spare_col + 1] + 1e-6          # edge degree (MXU)
            ew_e = jnp.maximum(ew_ref[...], 0.0)               # (tile_e, 1)
            scale = ew_e * _newton_recip(b)                    # relu(ew)/b
            col_ids = lax.broadcasted_iota(jnp.int32, t1.shape, 1)
            # Scale the real columns; spare column carries relu(ew) so pass 2
            # reads dh straight out of its own accumulator.
            t1s_ref[...] = jnp.where(col_ids == spare_col, ew_e, t1 * scale)

    per_step1 = (2 * 4 * 8 * tile_e              # src/tgt rows (sublane padded)
                 + 4 * 128 * tile_e              # ew column (lane padded)
                 + 4 * tile_n * in_pad           # x tile
                 + h_bytes * tile_n * tile_e     # H_hat tile
                 + 4 * in_pad * out_pad          # augmented W
                 + 4 * tile_e * out_pad)         # t1s block
    cost1 = pl.CostEstimate(
        flops=int(2 * n_pad * e_pad * out_pad
                  + 2 * n_pad * in_pad * out_pad * e_tiles
                  + 4 * n_pad * e_pad),
        transcendentals=int(e_pad),
        bytes_accessed=int(h_bytes * n_pad * e_pad
                           + 4 * n_pad * in_pad * e_tiles
                           + 4 * in_pad * out_pad * e_tiles
                           + 4 * e_pad * out_pad
                           + 4 * 3 * e_pad))

    t1s = pl.pallas_call(
        reduce_kernel,
        out_shape=jax.ShapeDtypeStruct((e_pad, out_pad), f32),
        grid_spec=pltpu.PrefetchScalarGridSpec(
            num_scalar_prefetch=0,
            grid=(e_tiles, n_tiles),      # E outer (parallel), N inner (reduction)
            in_specs=[
                pl.BlockSpec((1, tile_e), lambda e, n: (0, e)),        # src row
                pl.BlockSpec((1, tile_e), lambda e, n: (0, e)),        # tgt row
                pl.BlockSpec((tile_e, 1), lambda e, n: (e, 0)),        # ew col
                pl.BlockSpec((tile_n, in_pad), lambda e, n: (n, 0)),   # x tile
                pl.BlockSpec((tile_n, tile_e), lambda e, n: (n, e)),   # H_hat tile
                pl.BlockSpec((in_pad, out_pad), lambda e, n: (0, 0)),  # W_aug
            ],
            out_specs=pl.BlockSpec((tile_e, out_pad), lambda e, n: (e, 0)),
        ),
        compiler_params=pltpu.CompilerParams(
            dimension_semantics=("parallel", "arbitrary"),
            vmem_limit_bytes=_vmem_limit_bytes(per_step1)),
        cost_estimate=cost1,
    )(src_row, tgt_row, ew_col, x_p, h_hat, w_aug)

    # ---------------- pass 2: out[n, :] = relu((H_w @ t1s)[n, :] / dh[n]) ----
    def output_kernel(src_ref, tgt_ref, hhat_ref, t1s_ref, out_ref, acc_ref):
        n_step = pl.program_id(0)
        e_step = pl.program_id(1)

        @pl.when(e_step == 0)
        def _init():
            acc_ref[...] = jnp.zeros_like(acc_ref)

        node_ids = n_step * tile_n + lax.broadcasted_iota(
            jnp.int32, (tile_n, tile_e), 0)
        incident = jnp.logical_or(node_ids == src_ref[...],
                                  node_ids == tgt_ref[...])
        h_w = jnp.where(incident, jnp.maximum(hhat_ref[...], 0), 0.0)
        h_w = h_w.astype(compute_dtype)

        acc_ref[...] += jnp.dot(h_w, t1s_ref[...].astype(compute_dtype),
                                preferred_element_type=f32)

        @pl.when(e_step == pl.num_programs(1) - 1)
        def _finalize():
            acc = acc_ref[...]                                  # (tile_n, out_pad)
            dh = acc[:, spare_col:spare_col + 1] + 1e-6         # node degree (MXU)
            out_ref[...] = jnp.maximum(acc * _newton_recip(dh), 0.0).astype(
                out_ref.dtype)

    per_step2 = (2 * 4 * 8 * tile_e
                 + h_bytes * tile_n * tile_e
                 + 4 * tile_e * out_pad
                 + 2 * 4 * tile_n * out_pad)     # out block + acc scratch
    cost2 = pl.CostEstimate(
        flops=int(2 * n_pad * e_pad * out_pad + 4 * n_pad * e_pad),
        transcendentals=int(n_pad),
        bytes_accessed=int(h_bytes * n_pad * e_pad
                           + 4 * e_pad * out_pad * n_tiles
                           + 4 * n_pad * out_pad
                           + 4 * 2 * e_pad))

    out_padded = pl.pallas_call(
        output_kernel,
        out_shape=jax.ShapeDtypeStruct((n_pad, out_pad), f32),
        grid_spec=pltpu.PrefetchScalarGridSpec(
            num_scalar_prefetch=0,
            grid=(n_tiles, e_tiles),      # N outer (parallel), E inner (reduction)
            in_specs=[
                pl.BlockSpec((1, tile_e), lambda n, e: (0, e)),         # src row
                pl.BlockSpec((1, tile_e), lambda n, e: (0, e)),         # tgt row
                pl.BlockSpec((tile_n, tile_e), lambda n, e: (n, e)),    # H_hat tile
                pl.BlockSpec((tile_e, out_pad), lambda n, e: (e, 0)),   # scaled t1
            ],
            out_specs=pl.BlockSpec((tile_n, out_pad), lambda n, e: (n, 0)),
            scratch_shapes=[pltpu.VMEM((tile_n, out_pad), f32)],
        ),
        compiler_params=pltpu.CompilerParams(
            dimension_semantics=("parallel", "arbitrary"),
            vmem_limit_bytes=_vmem_limit_bytes(per_step2)),
        cost_estimate=cost2,
    )(src_row, tgt_row, h_hat, t1s)

    return out_padded[:N, :out_dim]


def _reference(x, edge_index, h_hat_full, edge_weights, w_lin, b_lin):
    """Pure-JAX reference mirroring the PyTorch forward (eval mode)."""
    N = x.shape[0]
    E = edge_index.shape[1]
    src, tgt = edge_index[0], edge_index[1]
    h_bin = jnp.zeros((N, E), jnp.float32)
    h_bin = h_bin.at[src, jnp.arange(E)].set(1.0)
    h_bin = h_bin.at[tgt, jnp.arange(E)].set(1.0)
    h_hat = h_hat_full[:N, :E]
    ew = jax.nn.relu(edge_weights[:E])
    h_w = h_bin * jax.nn.relu(h_hat)
    dh = jnp.sum(h_w * ew[None, :], axis=1) + 1e-6
    b = jnp.sum(h_w, axis=0) + 1e-6
    x_lin = x @ w_lin.T + b_lin
    out = (1.0 / dh)[:, None] * ((h_w * (ew / b)[None, :]) @ (h_w.T @ x_lin))
    return jax.nn.relu(out)


if __name__ == "__main__":
    # Small synthetic problem consistent with HypergraphConv(in_dim, out_dim).
    N, E, in_dim, out_dim = 16, 8, 32, 32
    max_nodes, max_edges = 64, 64

    key = jax.random.PRNGKey(0)
    k_x, k_h, k_w, k_b, k_s, k_t = jax.random.split(key, 6)

    x = jax.random.normal(k_x, (N, in_dim), jnp.float32)
    src = jax.random.randint(k_s, (E,), 0, N, jnp.int32)
    tgt = jax.random.randint(k_t, (E,), 0, N, jnp.int32)
    edge_index = jnp.stack([src, tgt], axis=0)                  # (2, E)

    # Parameters (deterministic synthetic init).
    h_hat_full = jax.random.normal(k_h, (max_nodes, max_edges), jnp.float32)
    edge_weights = jnp.ones((max_edges,), jnp.float32)
    limit = (6.0 / (in_dim + out_dim)) ** 0.5                   # xavier_uniform
    w_lin = jax.random.uniform(k_w, (out_dim, in_dim), jnp.float32, -limit, limit)
    b_lim = 1.0 / (in_dim ** 0.5)
    b_lin = jax.random.uniform(k_b, (out_dim,), jnp.float32, -b_lim, b_lim)

    # Exact path (f32 end to end) -> tight tolerance vs f32 reference.
    out_f32 = hypergraph_conv(x, edge_index, h_hat_full, edge_weights, w_lin,
                              b_lin, compute_dtype=jnp.float32)
    out_f32 = jax.block_until_ready(out_f32)
    ref = _reference(x, edge_index, h_hat_full, edge_weights, w_lin, b_lin)
    assert out_f32.shape == (N, out_dim)
    assert jnp.allclose(out_f32, ref, atol=1e-4, rtol=1e-3), (
        float(jnp.max(jnp.abs(out_f32 - ref))))

    # Performance path (bf16 streamed incidence, bf16 MXU, f32 accumulation)
    # -> compared against a reference using the same bf16-quantized H_hat.
    out_bf16 = hypergraph_conv(x, edge_index, h_hat_full, edge_weights, w_lin,
                               b_lin, compute_dtype=jnp.bfloat16)
    out_bf16 = jax.block_until_ready(out_bf16)
    h_hat_q = h_hat_full.astype(jnp.bfloat16).astype(jnp.float32)
    ref_q = _reference(x, edge_index, h_hat_q, edge_weights, w_lin, b_lin)
    assert jnp.allclose(out_bf16, ref_q, atol=5e-2, rtol=5e-2), (
        float(jnp.max(jnp.abs(out_bf16 - ref_q))))

    print("KERNEL_OK")
</pallas_src>

<mosaic_0001>
module attributes {stable_mosaic.version = 11 : i64} {
  func.func @reduce_kernel(%arg0: i32, %arg1: i32, %arg2: memref<1x128xi32, #tpu.memory_space<vmem>>, %arg3: memref<1x128xi32, #tpu.memory_space<vmem>>, %arg4: memref<128x1xf32, #tpu.memory_space<vmem>>, %arg5: memref<128x128xf32, #tpu.memory_space<vmem>>, %arg6: memref<128x128xf32, #tpu.memory_space<vmem>>, %arg7: memref<128x128xf32, #tpu.memory_space<vmem>>, %arg8: memref<128x128xf32, #tpu.memory_space<vmem>>) attributes {dimension_semantics = [#tpu.dimension_semantics<parallel>, #tpu.dimension_semantics<arbitrary>], iteration_bounds = array<i64: 1, 1>, scalar_prefetch = 0 : i64, scratch_operands = 0 : i64, tpu.core_type = #tpu.core_type<tc>, window_params = [{transform_indices = @transform_0, window_bounds = array<i64: 1, 128>}, {transform_indices = @transform_1, window_bounds = array<i64: 1, 128>}, {transform_indices = @transform_2, window_bounds = array<i64: 128, 1>}, {transform_indices = @transform_3, window_bounds = array<i64: 128, 128>}, {transform_indices = @transform_4, window_bounds = array<i64: 128, 128>}, {pipeline_mode = #tpu.pipeline_mode<synchronous>, transform_indices = @transform_5, window_bounds = array<i64: 128, 128>}, {transform_indices = @transform_6, window_bounds = array<i64: 128, 128>}]} {
    %c0_i32 = arith.constant 0 : i32
    %0 = arith.cmpi eq, %arg1, %c0_i32 : i32
    %1 = arith.extui %0 : i1 to i32
    %c0_i32_0 = arith.constant 0 : i32
    %2 = arith.cmpi ne, %1, %c0_i32_0 : i32
    scf.if %2 {
      %cst_19 = arith.constant 0.000000e+00 : f32
      %29 = vector.broadcast %cst_19 : f32 to vector<128x128xf32>
      %c0_20 = arith.constant 0 : index
      %c0_21 = arith.constant 0 : index
      %30 = vector.load %arg8[%c0_20, %c0_21] : memref<128x128xf32, #tpu.memory_space<vmem>>, vector<128x128xf32>
      tpu.vector_store %arg8[%c0_20, %c0_21], %29 {strides = array<i32>} : memref<128x128xf32, #tpu.memory_space<vmem>>, vector<128x128xf32>,
    } else {
    }
    %c128_i32 = arith.constant 128 : i32
    %3 = arith.muli %arg1, %c128_i32 : i32
    %4 = tpu.iota {dimensions = array<i32: 0>} : vector<128x128xi32>
    %5 = vector.broadcast %3 : i32 to vector<128x128xi32>
    %6 = arith.addi %5, %4 : vector<128x128xi32>
    %c0 = arith.constant 0 : index
    %c0_1 = arith.constant 0 : index
    %7 = vector.load %arg2[%c0, %c0_1] : memref<1x128xi32, #tpu.memory_space<vmem>>, vector<1x128xi32>
    %8 = vector.broadcast %7 : vector<1x128xi32> to vector<128x128xi32>
    %9 = arith.cmpi eq, %6, %8 : vector<128x128xi32>
    %c0_2 = arith.constant 0 : index
    %c0_3 = arith.constant 0 : index
    %10 = vector.load %arg3[%c0_2, %c0_3] : memref<1x128xi32, #tpu.memory_space<vmem>>, vector<1x128xi32>
    %11 = vector.broadcast %10 : vector<1x128xi32> to vector<128x128xi32>
    %12 = arith.cmpi eq, %6, %11 : vector<128x128xi32>
    %13 = arith.ori %9, %12 : vector<128x128xi1>
    %c0_4 = arith.constant 0 : index
    %c0_5 = arith.constant 0 : index
    %14 = vector.load %arg6[%c0_4, %c0_5] : memref<128x128xf32, #tpu.memory_space<vmem>>, vector<128x128xf32>
    %cst = arith.constant 0.000000e+00 : f32
    %15 = vector.broadcast %cst : f32 to vector<128x128xf32>
    %16 = arith.maximumf %14, %15 : vector<128x128xf32>
    %cst_6 = arith.constant 0.000000e+00 : f32
    %17 = vector.broadcast %cst_6 : f32 to vector<128x128xf32>
    %18 = arith.select %13, %16, %17 : vector<128x128xi1>, vector<128x128xf32>
    %c0_7 = arith.constant 0 : index
    %c0_8 = arith.constant 0 : index
    %19 = vector.load %arg5[%c0_7, %c0_8] : memref<128x128xf32, #tpu.memory_space<vmem>>, vector<128x128xf32>
    %c0_9 = arith.constant 0 : index
    %c0_10 = arith.constant 0 : index
    %20 = vector.load %arg7[%c0_9, %c0_10] : memref<128x128xf32, #tpu.memory_space<vmem>>, vector<128x128xf32>
    %cst_11 = arith.constant dense<0.000000e+00> : vector<128x128xf32>
    %21 = tpu.matmul %19, %20, %cst_11 {dimension_numbers = #tpu.dot_dimension_numbers<[1], [0], [0], [1], [0, 0, 1, 1], [], []>} : vector<128x128xf32>, vector<128x128xf32>, vector<128x128xf32> -> vector<128x128xf32>
    %c0_12 = arith.constant 0 : index
    %c0_13 = arith.constant 0 : index
    %22 = vector.load %arg8[%c0_12, %c0_13] : memref<128x128xf32, #tpu.memory_space<vmem>>, vector<128x128xf32>
    %cst_14 = arith.constant dense<0.000000e+00> : vector<128x128xf32>
    %23 = tpu.matmul %18, %21, %cst_14 {dimension_numbers = #tpu.dot_dimension_numbers<[0], [0], [1], [1], [0, 1, 1, 1], [], []>} : vector<128x128xf32>, vector<128x128xf32>, vector<128x128xf32> -> vector<128x128xf32>
    %24 = arith.addf %22, %23 : vector<128x128xf32>
    %c0_15 = arith.constant 0 : index
    %c0_16 = arith.constant 0 : index
    %25 = vector.load %arg8[%c0_15, %c0_16] : memref<128x128xf32, #tpu.memory_space<vmem>>, vector<128x128xf32>
    tpu.vector_store %arg8[%c0_15, %c0_16], %24 {strides = array<i32>} : memref<128x128xf32, #tpu.memory_space<vmem>>, vector<128x128xf32>,
    %c0_i32_17 = arith.constant 0 : i32
    %26 = arith.cmpi eq, %arg1, %c0_i32_17 : i32
    %27 = arith.extui %26 : i1 to i32
    %c0_i32_18 = arith.constant 0 : i32
    %28 = arith.cmpi ne, %27, %c0_i32_18 : i32
    scf.if %28 {
      %c0_19 = arith.constant 0 : index
      %c0_20 = arith.constant 0 : index
      %29 = vector.load %arg8[%c0_19, %c0_20] : memref<128x128xf32, #tpu.memory_space<vmem>>, vector<128x128xf32>
      %30 = vector.extract_strided_slice %29 {offsets = [0, 32], sizes = [128, 1], strides = [1, 1]} : vector<128x128xf32> to vector<128x1xf32>
      %cst_21 = arith.constant 9.99999997E-7 : f32
      %31 = vector.broadcast %cst_21 : f32 to vector<128x1xf32>
      %32 = arith.addf %30, %31 : vector<128x1xf32>
      %c0_22 = arith.constant 0 : index
      %c0_23 = arith.constant 0 : index
      %33 = vector.load %arg4[%c0_22, %c0_23] : memref<128x1xf32, #tpu.memory_space<vmem>>, vector<128x1xf32>
      %cst_24 = arith.constant 0.000000e+00 : f32
      %34 = vector.broadcast %cst_24 : f32 to vector<128x1xf32>
      %35 = arith.maximumf %33, %34 : vector<128x1xf32>
      %36 = tpu.reciprocal %32 {approx = true} : vector<128x1xf32> -> vector<128x1xf32>
      %37 = arith.mulf %32, %36 : vector<128x1xf32>
      %cst_25 = arith.constant 2.000000e+00 : f32
      %38 = vector.broadcast %cst_25 : f32 to vector<128x1xf32>
      %39 = arith.subf %38, %37 : vector<128x1xf32>
      %40 = arith.mulf %36, %39 : vector<128x1xf32>
      %41 = arith.mulf %35, %40 : vector<128x1xf32>
      %42 = tpu.iota {dimensions = array<i32: 1>} : vector<128x128xi32>
      %c32_i32 = arith.constant 32 : i32
      %43 = vector.broadcast %c32_i32 : i32 to vector<128x128xi32>
      %44 = arith.cmpi eq, %42, %43 : vector<128x128xi32>
      %45 = vector.broadcast %41 : vector<128x1xf32> to vector<128x128xf32>
      %46 = arith.mulf %29, %45 : vector<128x128xf32>
      %47 = vector.shape_cast %35 : vector<128x1xf32> to vector<128x1xf32>
      %48 = vector.broadcast %47 : vector<128x1xf32> to vector<128x128xf32>
      %49 = arith.select %44, %48, %46 : vector<128x128xi1>, vector<128x128xf32>
      %c0_26 = arith.constant 0 : index
      %c0_27 = arith.constant 0 : index
      %50 = vector.load %arg8[%c0_26, %c0_27] : memref<128x128xf32, #tpu.memory_space<vmem>>, vector<128x128xf32>
      tpu.vector_store %arg8[%c0_26, %c0_27], %49 {strides = array<i32>} : memref<128x128xf32, #tpu.memory_space<vmem>>, vector<128x128xf32>,
    } else {
    }
    return
  }
  func.func @transform_0(%arg0: i32, %arg1: i32) -> (i32, i32) {
    %c0_i32 = arith.constant 0 : i32
    %c0_i32_0 = arith.constant 0 : i32
    return %c0_i32, %arg0 : i32, i32
  }
  func.func @transform_1(%arg0: i32, %arg1: i32) -> (i32, i32) {
    %c0_i32 = arith.constant 0 : i32
    %c0_i32_0 = arith.constant 0 : i32
    return %c0_i32, %arg0 : i32, i32
  }
  func.func @transform_2(%arg0: i32, %arg1: i32) -> (i32, i32) {
    %c0_i32 = arith.constant 0 : i32
    %c0_i32_0 = arith.constant 0 : i32
    return %arg0, %c0_i32 : i32, i32
  }
  func.func @transform_3(%arg0: i32, %arg1: i32) -> (i32, i32) {
    %c0_i32 = arith.constant 0 : i32
    %c0_i32_0 = arith.constant 0 : i32
    return %arg1, %c0_i32 : i32, i32
  }
  func.func @transform_4(%arg0: i32, %arg1: i32) -> (i32, i32) {
    %c0_i32 = arith.constant 0 : i32
    return %arg1, %arg0 : i32, i32
  }
  func.func @transform_5(%arg0: i32, %arg1: i32) -> (i32, i32) {
    %c0_i32 = arith.constant 0 : i32
    %c0_i32_0 = arith.constant 0 : i32
    %c0_i32_1 = arith.constant 0 : i32
    return %c0_i32, %c0_i32_0 : i32, i32
  }
  func.func @transform_6(%arg0: i32, %arg1: i32) -> (i32, i32) {
    %c0_i32 = arith.constant 0 : i32
    %c0_i32_0 = arith.constant 0 : i32
    return %arg0, %c0_i32 : i32, i32
  }
}

</mosaic_0001>

<bundles_post_ra>
// kernel: tpu_custom_call.1
= control target key start
LH: loop header
LB: loop body
LE: loop exit
PB: predicated region body
PF: predicated region fallthrough
CT: control target
= control target key end

     0   :  { %11 = vsyncpa [#allocation3], 0  ;;  %s1532_s0 = inlined_call_operand.vmem [shape: s32[1,128], index: 0, kind: input, shape index: {}]   ;;  %s1533_s1 = inlined_call_operand.vmem [shape: s32[1,128], index: 1, kind: input, shape index: {}]   ;;  %s1534_s2 = inlined_call_operand.vmem [shape: f32[128,1], index: 2, kind: input, shape index: {}]   ;;  %s1535_s3 = inlined_call_operand.vmem [shape: f32[128,128], index: 3, kind: input, shape index: {}]   ;;  %s1536_s4 = inlined_call_operand.hbm [shape: f32[128,128], index: 4, kind: input, shape index: {}]   ;;  %s1537_s5 = inlined_call_operand.hbm [shape: f32[128,128], index: 5, kind: input, shape index: {}]   ;;  %s1538_s6 = inlined_call_operand.hbm [shape: f32[128,128], index: 6, kind: output, shape index: {}]  }
   0x1   :  { %12 = vsyncpa [#allocation6], 0 }
   0x2   :  { %13 = vsyncpa [#allocation4], 0  ;;  %s26_s23 = sshll.u32 %s1536_s4, 4  ;;  %s1050_s24 = smov [#allocation2]   ;;  %s27_s23 = int_to_ptr.hbm [resolvable:$true] %s26_s23 }
   0x3   :  { %s28_s25 = sshll.u32 %s1050_s24, 4  ;;  %s39_s28 = sshll.u32 %s1537_s5, 4  ;;  %s29_s25 = int_to_ptr.vmem [resolvable:$true] %s28_s25  ;;  %s40_s28 = int_to_ptr.hbm [resolvable:$true] %s39_s28 }
   0x4   :  { %s1051_s29 = smov 128   ;;  %s1052_s30 = smov 8  }
   0x5   :  { %34 = dma.hbm_to_vmem [thread:$0]  %s27_s23, 2048, %s29_s25, [#allocation3], %s1051_s29, %s1051_s29, %s1052_s30  }
   0x6   :  { %s1053_s7 = smov [#allocation5]  }
   0x7   :  { %s41_s8 = sshll.u32 %s1053_s7, 4  ;;  %s42_s8 = int_to_ptr.vmem [resolvable:$true] %s41_s8 }
   0x8   :  { %47 = dma.hbm_to_vmem [thread:$0]  %s40_s28, 2048, %s42_s8, [#allocation6], %s1051_s29, %s1051_s29, %s1052_s30  }
   0x9   :  { %1044 = dma.done.wait [#allocation3], 2048  }
   0xa   :  { %1045 = vsyncadd [#allocation3], 4294965248 }
   0xb   :  { %1046 = dma.done.wait [#allocation6], 2048  }
   0xc   :  { %1047 = vsyncadd [#allocation6], 4294965248  ;;  %v1539_v0 = vlaneseq  ;;  %v242_v1 = vld [vmem:[#allocation5 + $0x78] sm:$0xff]  ;;  %v241_v2 = vld [vmem:[#allocation5 + $0x70] sm:$0xff]  ;;  %s1055_s14 = smov 96   ;;  %s881_s23 = sshll.u32 %s1538_s6, 4  ;;  %s882_s23 = int_to_ptr.hbm [resolvable:$true] %s881_s23 }
   0xd   :  { %895 = vmatpush.msra.mxu2 %v242_v1  ;;  %243 = vmatpush.msra.mxu0 %v242_v1  ;;  %v240_v4 = vld [vmem:[#allocation5 + $0x68] sm:$0xff]  ;;  %v239_v5 = vld [vmem:[#allocation5 + $0x60] sm:$0xff]  ;;  %v238_v10 = vld [vmem:[#allocation5 + $0x58] sm:$0xff] }
   0xe   :  { %v1105_v3 = vshrl.u32 %v1539_v0, 7  ;;  %v1111_v7 = vld [vmem:[%s1532_s0] ss:$0 sm:$0xff]  ;;  %v164_v12 = vld [vmem:[#allocation2 + $0x8] sm:$0xff]  ;;  %v237_v13 = vld [vmem:[#allocation5 + $0x50] sm:$0xff] }
   0xf   :  { %896 = vmatpush.msra.mxu2 %v241_v2  ;;  %244 = vmatpush.msra.mxu0 %v241_v2  ;;  %v1116_v8 = vld [vmem:[%s1533_s1] ss:$0 sm:$0xff]  ;;  %v236_v15 = vld [vmem:[#allocation5 + $0x48] sm:$0xff]  ;;  %v180_v16 = vmax.f32 %v164_v12, 0.0  ;;  %v234_v19 = vld [vmem:[#allocation5 + $0x38] sm:$0xff] }
  0x10   :  { %v79_v6 = vadd.s32 8, %v1105_v3  ;;  %v163_v9 = vld [vmem:[#allocation2] sm:$0xff]  ;;  %vm113_vm0 = vcmp.eq.s32.totalorder %v1105_v3, %v1111_v7  ;;  %vm131_vm1 = vcmp.eq.s32.totalorder %v1105_v3, %v1116_v8  ;;  %v80_v18 = vadd.s32 16, %v1105_v3  ;;  %v165_v21 = vld [vmem:[#allocation2 + $0x10] sm:$0xff]  ;;  %v232_v23 = vld [vmem:[#allocation5 + $0x28] sm:$0xff] }
  0x11   :  { %897 = vmatpush.msra.mxu2 %v240_v4  ;;  %245 = vmatpush.msra.mxu0 %v240_v4  ;;  %v179_v11 = vmax.f32 %v163_v9, 0.0  ;;  %vm147_vm2 = vmor %vm113_vm0, %vm131_vm1  ;;  %v235_v17 = vld [vmem:[#allocation5 + $0x40] sm:$0xff]  ;;  %v233_v22 = vld [vmem:[#allocation5 + $0x30] sm:$0xff]  ;;  %v181_v24 = vmax.f32 %v165_v21, 0.0  ;;  %v81_v26 = vadd.s32 24, %v1105_v3  ;;  %v82_v34 = vadd.s32 32, %v1105_v3 }
  0x12   :  { %vm114_vm3 = vcmp.eq.s32.totalorder %v79_v6, %v1111_v7  ;;  %vm132_vm4 = vcmp.eq.s32.totalorder %v79_v6, %v1116_v8  ;;  %vm115_vm6 = vcmp.eq.s32.totalorder %v80_v18, %v1111_v7  ;;  %vm133_vm7 = vcmp.eq.s32.totalorder %v80_v18, %v1116_v8  ;;  %v231_v25 = vld [vmem:[#allocation5 + $0x20] sm:$0xff]  ;;  %v230_v27 = vld [vmem:[#allocation5 + $0x18] sm:$0xff]  ;;  %v229_v30 = vld [vmem:[#allocation5 + $0x10] sm:$0xff] }
  0x13   :  { %898 = vmatpush.msra.mxu2 %v239_v5  ;;  %246 = vmatpush.msra.mxu0 %v239_v5  ;;  %v195_v14 = vsel %vm147_vm2, %v179_v11, 0.0  ;;  %vm148_vm5 = vmor %vm114_vm3, %vm132_vm4  ;;  %v166_v29 = vld [vmem:[#allocation2 + $0x18] sm:$0xff]  ;;  %vm116_vm9 = vcmp.eq.s32.totalorder %v81_v26, %v1111_v7  ;;  %vm134_vm10 = vcmp.eq.s32.totalorder %v81_v26, %v1116_v8  ;;  %v228_v31 = vld [vmem:[#allocation5 + $0x8] sm:$0xff]  ;;  %vm117_vm12 = vcmp.eq.s32.totalorder %v82_v34, %v1111_v7 }
  0x14   :  { %324 = vxpose.xlu0.b32.start [1/16] %v195_v14, 128  ;;  %v196_v20 = vsel %vm148_vm5, %v180_v16, 0.0  ;;  %vm149_vm8 = vmor %vm115_vm6, %vm133_vm7  ;;  %v182_v32 = vmax.f32 %v166_v29, 0.0  ;;  %v227_v33 = vld [vmem:[#allocation5] sm:$0xff]  ;;  %vm135_vm13 = vcmp.eq.s32.totalorder %v82_v34, %v1116_v8  ;;  %v83_v40 = vadd.s32 40, %v1105_v3  ;;  %v220_v41 = vld [vmem:[%s1535_s3 + $0x48] sm:$0xff] }
  0x15   :  { %899 = vmatpush.msra.mxu2 %v238_v10  ;;  %247 = vmatpush.msra.mxu0 %v238_v10  ;;  %v197_v28 = vsel %vm149_vm8, %v181_v24, 0.0  ;;  %vm150_vm11 = vmor %vm116_vm9, %vm134_vm10  ;;  %v219_v35 = vld [vmem:[%s1535_s3 + $0x40] sm:$0xff]  ;;  %v212_v43 = vld [vmem:[%s1535_s3 + $0x8] sm:$0xff]  ;;  %v84_v46 = vadd.s32 48, %v1105_v3  ;;  %v85_v52 = vadd.s32 56, %v1105_v3  ;;  %v86_v58 = vadd.s32 64, %v1105_v3 }
  0x16   :  { %v198_v36 = vsel %vm150_vm11, %v182_v32, 0.0  ;;  %v211_v37 = vld [vmem:[%s1535_s3] sm:$0xff]  ;;  %vm151_vm14 = vmor %vm117_vm12, %vm135_vm13  ;;  %v168_v44 = vld [vmem:[#allocation2 + $0x28] sm:$0xff]  ;;  %vm118_vm15 = vcmp.eq.s32.totalorder %v83_v40, %v1111_v7  ;;  %vm136_vm0 = vcmp.eq.s32.totalorder %v83_v40, %v1116_v8  ;;  %v87_v1 = vadd.s32 72, %v1105_v3 }
  0x17   :  { %900 = vmatpush.msra.mxu2 %v237_v13  ;;  %248 = vmatpush.msra.mxu0 %v237_v13  ;;  %v167_v38 = vld [vmem:[#allocation2 + $0x20] sm:$0xff]  ;;  %v184_v45 = vmax.f32 %v168_v44, 0.0  ;;  %vm152_vm1 = vmor %vm118_vm15, %vm136_vm0  ;;  %v221_v47 = vld [vmem:[%s1535_s3 + $0x50] sm:$0xff]  ;;  %vm119_vm2 = vcmp.eq.s32.totalorder %v84_v46, %v1111_v7  ;;  %vm137_vm3 = vcmp.eq.s32.totalorder %v84_v46, %v1116_v8  ;;  %vm120_vm5 = vcmp.eq.s32.totalorder %v85_v52, %v1111_v7 }
  0x18   :  { %v183_v39 = vmax.f32 %v167_v38, 0.0  ;;  %v213_v49 = vld [vmem:[%s1535_s3 + $0x10] sm:$0xff]  ;;  %vm153_vm4 = vmor %vm119_vm2, %vm137_vm3  ;;  %v222_v53 = vld [vmem:[%s1535_s3 + $0x58] sm:$0xff]  ;;  %vm138_vm6 = vcmp.eq.s32.totalorder %v85_v52, %v1116_v8  ;;  %vm121_vm8 = vcmp.eq.s32.totalorder %v86_v58, %v1111_v7  ;;  %vm139_vm9 = vcmp.eq.s32.totalorder %v86_v58, %v1116_v8 }
  0x19   :  { %901 = vmatpush.msra.mxu2 %v236_v15  ;;  %249 = vmatpush.msra.mxu0 %v236_v15  ;;  %v200_v48 = vsel %vm152_vm1, %v184_v45, 0.0  ;;  %v169_v50 = vld [vmem:[#allocation2 + $0x30] sm:$0xff]  ;;  %v214_v55 = vld [vmem:[%s1535_s3 + $0x18] sm:$0xff]  ;;  %vm154_vm7 = vmor %vm120_vm5, %vm138_vm6  ;;  %vm122_vm11 = vcmp.eq.s32.totalorder %v87_v1, %v1111_v7  ;;  %vm140_vm12 = vcmp.eq.s32.totalorder %v87_v1, %v1116_v8  ;;  %v88_v10 = vadd.s32 80, %v1105_v3 }
  0x1a   :  { %v199_v42 = vsel %vm151_vm14, %v183_v39, 0.0  ;;  %v185_v51 = vmax.f32 %v169_v50, 0.0  ;;  %v170_v56 = vld [vmem:[#allocation2 + $0x38] sm:$0xff]  ;;  %v223_v59 = vld [vmem:[%s1535_s3 + $0x60] sm:$0xff]  ;;  %vm155_vm10 = vmor %vm121_vm8, %vm139_vm9  ;;  %v89_v16 = vadd.s32 88, %v1105_v3  ;;  %v91_v26 = vadd.s32 104, %v1105_v3 }
  0x1b   :  { %902 = vmatpush.msra.mxu2 %v235_v17  ;;  %250 = vmatpush.msra.mxu0 %v235_v17  ;;  %v186_v57 = vmax.f32 %v170_v56, 0.0  ;;  %v215_v61 = vld [vmem:[%s1535_s3 + $0x20] sm:$0xff]  ;;  %v224_v2 = vld [vmem:[%s1535_s3 + $0x68] sm:$0xff]  ;;  %vm156_vm13 = vmor %vm122_vm11, %vm140_vm12  ;;  %vm123_vm14 = vcmp.eq.s32.totalorder %v88_v10, %v1111_v7  ;;  %vm141_vm15 = vcmp.eq.s32.totalorder %v88_v10, %v1116_v8  ;;  %v93_v34 = vadd.s32 120, %v1105_v3 }
  0x1c   :  { %325 = vxpose.xlu0.b32.cont [2/16] %v196_v20, 128  ;;  %v201_v54 = vsel %vm153_vm4, %v185_v51, 0.0  ;;  %v171_v62 = vld [vmem:[#allocation2 + $0x40] sm:$0xff]  ;;  %v216_v5 = vld [vmem:[%s1535_s3 + $0x28] sm:$0xff]  ;;  %v225_v11 = vld [vmem:[%s1535_s3 + $0x70] sm:$0xff]  ;;  %vm124_vm1 = vcmp.eq.s32.totalorder %v89_v16, %v1111_v7  ;;  %vm142_vm2 = vcmp.eq.s32.totalorder %v89_v16, %v1116_v8  ;;  %vm144_vm8 = vcmp.eq.s32.totalorder %v91_v26, %v1116_v8 }
  0x1d   :  { %903 = vmatpush.msra.mxu2 %v234_v19  ;;  %251 = vmatpush.msra.mxu0 %v234_v19  ;;  %v202_v60 = vsel %vm154_vm7, %v186_v57, 0.0  ;;  %v187_v63 = vmax.f32 %v171_v62, 0.0  ;;  %v172_v6 = vld [vmem:[#allocation2 + $0x48] sm:$0xff]  ;;  %v217_v13 = vld [vmem:[%s1535_s3 + $0x30] sm:$0xff]  ;;  %vm157_vm0 = vmor %vm123_vm14, %vm141_vm15  ;;  %vm126_vm7 = vcmp.eq.s32.totalorder %v91_v26, %v1111_v7  ;;  %vm146_vm14 = vcmp.eq.s32.totalorder %v93_v34, %v1116_v8 }
  0x1e   :  { %v188_v9 = vmax.f32 %v172_v6, 0.0  ;;  %v173_v14 = vld [vmem:[#allocation2 + $0x50] sm:$0xff]  ;;  %v226_v17 = vld [vmem:[%s1535_s3 + $0x78] sm:$0xff]  ;;  %vm158_vm3 = vmor %vm124_vm1, %vm142_vm2 }
  0x1f   :  { %904 = vmatpush.msra.mxu2 %v233_v22  ;;  %252 = vmatpush.msra.mxu0 %v233_v22  ;;  %v203_v4 = vsel %vm155_vm10, %v187_v63, 0.0  ;;  %v189_v15 = vmax.f32 %v173_v14, 0.0  ;;  %v218_v19 = vld [vmem:[%s1535_s3 + $0x38] sm:$0xff]  ;;  %v90_v22 = vadd.s32 96, %v1105_v3  ;;  %v175_v24 = vld [vmem:[#allocation2 + $0x60] sm:$0xff]  ;;  %vm160_vm9 = vmor %vm126_vm7, %vm144_vm8 }
  0x20   :  { %v204_v12 = vsel %vm156_vm13, %v188_v9, 0.0  ;;  %v174_v20 = vld [vmem:[#allocation2 + $0x58] sm:$0xff]  ;;  %v177_v32 = vld [vmem:[#allocation2 + $0x70] sm:$0xff]  ;;  %vm128_vm13 = vcmp.eq.s32.totalorder %v93_v34, %v1111_v7  ;;  %v1229_v62 = vld [vmem:[%s1534_s2 + $0x8] sm:$0xff] }
  0x21   :  { %905 = vmatpush.msra.mxu2 %v232_v23  ;;  %253 = vmatpush.msra.mxu0 %v232_v23  ;;  %v205_v18 = vsel %vm157_vm0, %v189_v15, 0.0  ;;  %v190_v21 = vmax.f32 %v174_v20, 0.0  ;;  %vm125_vm4 = vcmp.eq.s32.totalorder %v90_v22, %v1111_v7  ;;  %vm143_vm5 = vcmp.eq.s32.totalorder %v90_v22, %v1116_v8  ;;  %vm162_vm15 = vmor %vm128_vm13, %vm146_vm14  ;;  %v1246_v9 = vld [vmem:[%s1534_s2 + $0x28] sm:$0xff]  ;;  %v1269_v16 = vld [vmem:[%s1534_s2 + $0x20] sm:$0xff] }
  0x22   :  { %vm159_vm6 = vmor %vm125_vm4, %vm143_vm5  ;;  %v505_v1 = vmax.f32 %v1229_v62, 0.0  ;;  %v509_v10 = vmax.f32 %v1246_v9, 0.0  ;;  %v1294_v22 = vld [vmem:[%s1534_s2 + $0x58] sm:$0xff]  ;;  %v1303_v26 = vld [vmem:[%s1534_s2 + $0x40] sm:$0xff] }
  0x23   :  { %906 = vmatpush.msra.mxu2 %v231_v25  ;;  %254 = vmatpush.msra.mxu0 %v231_v25  ;;  %v206_v23 = vsel %vm158_vm3, %v190_v21, 0.0  ;;  %v191_v25 = vmax.f32 %v175_v24, 0.0  ;;  %v1286_v21 = vld [vmem:[%s1534_s2 + $0x30] sm:$0xff]  ;;  %v515_v24 = vmax.f32 %v1294_v22, 0.0 }
  0x24   :  { %326 = vxpose.xlu0.b32.cont [3/16] %v197_v28, 128  ;;  %v176_v28 = vld [vmem:[#allocation2 + $0x68] sm:$0xff] }
  0x25   :  { %907 = vmatpush.msra.mxu2 %v230_v27  ;;  %255 = vmatpush.msra.mxu0 %v230_v27  ;;  %v207_v27 = vsel %vm159_vm6, %v191_v25, 0.0  ;;  %v192_v29 = vmax.f32 %v176_v28, 0.0  ;;  %v512_v28 = vmax.f32 %v1303_v26, 0.0 }
  0x27   :  { %908 = vmatpush.msra.mxu2 %v229_v30  ;;  %256 = vmatpush.msra.mxu0 %v229_v30  ;;  %v92_v30 = vadd.s32 112, %v1105_v3 }
  0x29   :  { %909 = vmatpush.msra.mxu2 %v228_v31  ;;  %257 = vmatpush.msra.mxu0 %v228_v31  ;;  %v208_v31 = vsel %vm160_vm9, %v192_v29, 0.0  ;;  %vm127_vm10 = vcmp.eq.s32.totalorder %v92_v30, %v1111_v7  ;;  %vm145_vm11 = vcmp.eq.s32.totalorder %v92_v30, %v1116_v8 }
  0x2a   :  { %vm161_vm12 = vmor %vm127_vm10, %vm145_vm11 }
  0x2b   :  { %910 = vmatpush.msra.mxu2 %v227_v33  ;;  %258 = vmatpush.msra.mxu0 %v227_v33  ;;  %v193_v33 = vmax.f32 %v177_v32, 0.0 }
  0x2c   :  { %283 = vmatmul.f32.vlgmr.msra.gmra.mxu2 %v219_v35  ;;  %327 = vxpose.xlu0.b32.cont [4/16] %v198_v36, 128  ;;  %v178_v36 = vld [vmem:[#allocation2 + $0x78] sm:$0xff] }
  0x2d   :  { %259 = vmatmul.f32.vlgmr.msra.gmra.mxu0 %v211_v37  ;;  %v209_v35 = vsel %vm161_vm12, %v193_v33, 0.0  ;;  %v194_v37 = vmax.f32 %v178_v36, 0.0  ;;  %v1331_v33 = vld [vmem:[%s1534_s2 + $0x60] sm:$0xff] }
  0x2e   :  { %v516_v34 = vmax.f32 %v1331_v33, 0.0 }
  0x2f   :  { %v210_v38 = vsel %vm162_vm15, %v194_v37, 0.0 }
  0x34   :  { %286 = vmatmul.f32.gmra.mxu2 %v220_v41  ;;  %328 = vxpose.xlu0.b32.cont [5/16] %v199_v42, 128 }
  0x35   :  { %262 = vmatmul.f32.gmra.mxu0 %v212_v43 }
  0x3c   :  { %289 = vmatmul.f32.gmra.mxu2 %v221_v47  ;;  %329 = vxpose.xlu0.b32.cont [6/16] %v200_v48, 128 }
  0x3d   :  { %265 = vmatmul.f32.gmra.mxu0 %v213_v49 }
  0x44   :  { %292 = vmatmul.f32.gmra.mxu2 %v222_v53  ;;  %330 = vxpose.xlu0.b32.cont [7/16] %v201_v54, 128 }
  0x45   :  { %268 = vmatmul.f32.gmra.mxu0 %v214_v55 }
  0x4c   :  { %295 = vmatmul.f32.gmra.mxu2 %v223_v59  ;;  %331 = vxpose.xlu0.b32.cont [8/16] %v202_v60, 128 }
  0x4d   :  { %271 = vmatmul.f32.gmra.mxu0 %v215_v61 }
  0x54   :  { %298 = vmatmul.f32.gmra.mxu2 %v224_v2  ;;  %332 = vxpose.xlu0.b32.cont [9/16] %v203_v4, 128  ;;  %v1054_v2 = vmov 0   ;;  %v1237_v4 = vld [vmem:[%s1534_s2 + $0x18] sm:$0xff] }
  0x55   :  { %274 = vmatmul.f32.gmra.mxu0 %v216_v5  ;;  %936 = vset.pattern.permute.xlu1 %v1054_v2  ;;  %v507_v5 = vmax.f32 %v1237_v4, 0.0 }
  0x56   :  { %937 = vset.pattern.permute.xlu2 %v1054_v2  ;;  %770 = vperm.xlu1 %936, %v505_v1  }
  0x5c   :  { %301 = vmatmul.f32.gmra.mxu2 %v225_v11  ;;  %333 = vxpose.xlu0.b32.cont [10/16] %v204_v12, 128  ;;  %v1255_v11 = vld [vmem:[%s1534_s2 + $0x38] sm:$0xff] }
  0x5d   :  { %277 = vmatmul.f32.gmra.mxu0 %v217_v13  ;;  %v1260_v13 = vld [vmem:[%s1534_s2 + $0x10] sm:$0xff]  ;;  %v1540_v15 = vmax.f32 %v1255_v11, 0.0 }
  0x5e   :  { %780 = vperm.xlu1 %936, %v507_v5   ;;  %v506_v14 = vmax.f32 %v1260_v13, 0.0 }
  0x60   :  { %775 = vperm.xlu2 %937, %v506_v14  }
  0x64   :  { %304 = vmatmul.f32.gmra.mxu2 %v226_v17  ;;  %334 = vxpose.xlu0.b32.cont [11/16] %v205_v18, 128  ;;  %v1277_v17 = vld [vmem:[%s1534_s2 + $0x48] sm:$0xff]  ;;  %v508_v18 = vmax.f32 %v1269_v16, 0.0 }
  0x65   :  { %280 = vmatmul.f32.gmra.mxu0 %v218_v19  ;;  %v513_v20 = vmax.f32 %v1277_v17, 0.0 }
  0x66   :  { %790 = vperm.xlu1 %936, %v509_v10  }
  0x68   :  { %785 = vperm.xlu2 %937, %v508_v18  }
  0x6c   :  { %335 = vxpose.xlu0.b32.cont [12/16] %v206_v23, 128  ;;  %v1542_v23 = vmax.f32 %v1286_v21, 0.0 }
  0x6e   :  { %800 = vperm.xlu1 %936, %v1540_v15  }
  0x70   :  { %795 = vperm.xlu2 %937, %v1542_v23  }
  0x74   :  { %336 = vxpose.xlu0.b32.cont [13/16] %v207_v27, 128  ;;  %v1311_v27 = vld [vmem:[%s1534_s2 + $0x68] sm:$0xff] }
  0x75   :  { %v1541_v29 = vmax.f32 %v1311_v27, 0.0 }
  0x76   :  { %810 = vperm.xlu1 %936, %v513_v20  }
  0x78   :  { %805 = vperm.xlu2 %937, %v512_v28  }
  0x7c   :  { %337 = vxpose.xlu0.b32.cont [14/16] %v208_v31, 128  ;;  %v1323_v31 = vld [vmem:[%s1534_s2 + $0x50] sm:$0xff] }
  0x7d   :  { %v514_v32 = vmax.f32 %v1323_v31, 0.0 }
  0x7e   :  { %820 = vperm.xlu1 %936, %v515_v24  }
  0x80   :  { %815 = vperm.xlu2 %937, %v514_v32  }
  0x84   :  { %338 = vxpose.xlu0.b32.cont [15/16] %v209_v35, 128 }
  0x86   :  { %830 = vperm.xlu1 %936, %v1541_v29  }
  0x88   :  { %825 = vperm.xlu2 %937, %v516_v34  }
  0x8c   :  { %339 = vxpose.xlu0.b32.end [16/16] %v210_v38, 128 }
  0xaa   :  { %v260_v40 = vpop.f32.mrf.mxu0 }
  0xaf   :  { %v284_v39 = vpop.f32.mrf.mxu2 }
  0xb2   :  { %v263_v43 = vpop.f32.mrf.mxu0 }
  0xb7   :  { %v287_v41 = vpop.f32.mrf.mxu2 }
  0xb8   :  { %v340_v42 = vpop.trf.xlu0 }
  0xba   :  { %v266_v46 = vpop.f32.mrf.mxu0 }
  0xbf   :  { %v290_v44 = vpop.f32.mrf.mxu2 }
  0xc0   :  { %v341_v45 = vpop.trf.xlu0 }
  0xc2   :  { %v269_v48 = vpop.f32.mrf.mxu0 }
  0xc7   :  { %v293_v3 = vpop.f32.mrf.mxu2 }
  0xc8   :  { %v1214_v47 = vpop.trf.xlu0 }
  0xca   :  { %v272_v50 = vpop.f32.mrf.mxu0 }
  0xcf   :  { %v296_v7 = vpop.f32.mrf.mxu2 }
  0xd0   :  { %v1216_v49 = vpop.trf.xlu0 }
  0xd2   :  { %v275_v53 = vpop.f32.mrf.mxu0 }
  0xd7   :  { %v299_v8 = vpop.f32.mrf.mxu2 }
  0xd8   :  { %v1218_v51 = vpop.trf.xlu0 }
  0xda   :  { %v278_v57 = vpop.f32.mrf.mxu0 }
  0xdf   :  { %v302_v52 = vpop.f32.mrf.mxu2 }
  0xe0   :  { %v1220_v54 = vpop.trf.xlu0 }
  0xe2   :  { %v281_v59 = vpop.f32.mrf.mxu0 }
  0xe7   :  { %v305_v55 = vpop.f32.mrf.mxu2 }
  0xe8   :  { %356 = vmatpush.msra.mxu1 %v305_v55  ;;  %911 = vmatpush.msra.mxu3 %v305_v55  ;;  %v1222_v56 = vpop.trf.xlu0 }
  0xea   :  { %357 = vmatpush.msra.mxu1 %v302_v52  ;;  %912 = vmatpush.msra.mxu3 %v302_v52 }
  0xec   :  { %358 = vmatpush.msra.mxu1 %v299_v8  ;;  %913 = vmatpush.msra.mxu3 %v299_v8 }
  0xee   :  { %359 = vmatpush.msra.mxu1 %v296_v7  ;;  %914 = vmatpush.msra.mxu3 %v296_v7 }
  0xf0   :  { %360 = vmatpush.msra.mxu1 %v293_v3  ;;  %915 = vmatpush.msra.mxu3 %v293_v3  ;;  %v1224_v58 = vpop.trf.xlu0 }
  0xf2   :  { %361 = vmatpush.msra.mxu1 %v290_v44  ;;  %916 = vmatpush.msra.mxu3 %v290_v44 }
  0xf3   :  { %935 = vset.pattern.permute.xlu0 %v1054_v2 }
  0xf4   :  { %362 = vmatpush.msra.mxu1 %v287_v41  ;;  %917 = vmatpush.msra.mxu3 %v287_v41 }
  0xf6   :  { %363 = vmatpush.msra.mxu1 %v284_v39  ;;  %918 = vmatpush.msra.mxu3 %v284_v39 }
  0xf8   :  { %364 = vmatpush.msra.mxu1 %v281_v59  ;;  %919 = vmatpush.msra.mxu3 %v281_v59  ;;  %v348_v60 = vpop.trf.xlu0 }
  0xfa   :  { %365 = vmatpush.msra.mxu1 %v278_v57  ;;  %920 = vmatpush.msra.mxu3 %v278_v57 }
  0xfc   :  { %366 = vmatpush.msra.mxu1 %v275_v53  ;;  %921 = vmatpush.msra.mxu3 %v275_v53 }
  0xfe   :  { %367 = vmatpush.msra.mxu1 %v272_v50  ;;  %922 = vmatpush.msra.mxu3 %v272_v50 }
 0x100   :  { %368 = vmatpush.msra.mxu1 %v269_v48  ;;  %923 = vmatpush.msra.mxu3 %v269_v48  ;;  %v349_v61 = vpop.trf.xlu0 }
 0x102   :  { %369 = vmatpush.msra.mxu1 %v266_v46  ;;  %924 = vmatpush.msra.mxu3 %v266_v46 }
 0x104   :  { %370 = vmatpush.msra.mxu1 %v263_v43  ;;  %925 = vmatpush.msra.mxu3 %v263_v43 }
 0x106   :  { %371 = vmatpush.msra.mxu1 %v260_v40  ;;  %926 = vmatpush.msra.mxu3 %v260_v40 }
 0x107   :  { %372 = vmatmul.f32.vlgmr.msra.gmra.mxu1 %v340_v42  ;;  %396 = vmatmul.f32.vlgmr.msra.gmra.mxu3 %v348_v60 }
 0x108   :  { %v350_v63 = vpop.trf.xlu0 }
 0x10f   :  { %375 = vmatmul.f32.gmra.mxu1 %v341_v45  ;;  %399 = vmatmul.f32.gmra.mxu3 %v349_v61 }
 0x110   :  { %v351_v6 = vpop.trf.xlu0 }
 0x117   :  { %378 = vmatmul.f32.gmra.mxu1 %v1214_v47  ;;  %402 = vmatmul.f32.gmra.mxu3 %v350_v63 }
 0x118   :  { %v352_v12 = vpop.trf.xlu0 }
 0x11f   :  { %381 = vmatmul.f32.gmra.mxu1 %v1216_v49  ;;  %405 = vmatmul.f32.gmra.mxu3 %v351_v6 }
 0x120   :  { %v353_v19 = vpop.trf.xlu0 }
 0x127   :  { %384 = vmatmul.f32.gmra.mxu1 %v1218_v51  ;;  %408 = vmatmul.f32.gmra.mxu3 %v352_v12 }
 0x128   :  { %v354_v25 = vpop.trf.xlu0 }
 0x12f   :  { %387 = vmatmul.f32.gmra.mxu1 %v1220_v54  ;;  %411 = vmatmul.f32.gmra.mxu3 %v353_v19 }
 0x130   :  { %v355_v30 = vpop.trf.xlu0 }
 0x137   :  { %390 = vmatmul.f32.gmra.mxu1 %v1222_v56  ;;  %414 = vmatmul.f32.gmra.mxu3 %v354_v25 }
 0x13f   :  { %393 = vmatmul.f32.gmra.mxu1 %v1224_v58  ;;  %417 = vmatmul.f32.gmra.mxu3 %v355_v30 }
 0x184   :  { %v1336_v35 = vpop.f32.mrf.mxu1 }
 0x185   :  { %v472_v36 = vadd.f32 1e-06, %v1336_v35 }
 0x187   :  { %940 = vrcp.f32 %v472_v36 }
 0x18a   :  { %v1339_v37 = vpop.f32.mrf.mxu3 }
 0x18b   :  { %v480_v39 = vadd.f32 1e-06, %v1339_v37 }
 0x18c   :  { %v1341_v38 = vpop.f32.mrf.mxu1 }
 0x18d   :  { %v941_v40 = vpop.eup %940  ;;  %942 = vrcp.f32 %v480_v39  ;;  %v473_v41 = vadd.f32 1e-06, %v1341_v38 }
 0x18e   :  { %v536_v42 = vmul.f32 %v941_v40, %v472_v36 }
 0x18f   :  { %944 = vrcp.f32 %v473_v41 }
 0x190   :  { %v552_v44 = vsub.f32 2.0, %v536_v42 }
 0x192   :  { %v1345_v43 = vpop.f32.mrf.mxu3  ;;  %v568_v46 = vmul.f32 %v941_v40, %v552_v44 }
 0x193   :  { %v943_v3 = vpop.eup %942  ;;  %v481_v47 = vadd.f32 1e-06, %v1345_v43 }
 0x194   :  { %v1347_v45 = vpop.f32.mrf.mxu1  ;;  %600 = vrot.lane.b32.xlu1 %v568_v46, %s1055_s14  ;;  %v544_v48 = vmul.f32 %v943_v3, %v480_v39 }
 0x195   :  { %946 = vrcp.f32 %v481_v47  ;;  %v474_v7 = vadd.f32 1e-06, %v1347_v45  ;;  %v945_v8 = vpop.eup %944 }
 0x196   :  { %v560_v49 = vsub.f32 2.0, %v544_v48  ;;  %v537_v53 = vmul.f32 %v945_v8, %v473_v41 }
 0x197   :  { %948 = vrcp.f32 %v474_v7 }
 0x198   :  { %v576_v52 = vmul.f32 %v943_v3, %v560_v49  ;;  %v553_v60 = vsub.f32 2.0, %v537_v53 }
 0x19a   :  { %v1352_v50 = vpop.f32.mrf.mxu3  ;;  %v569_v12 = vmul.f32 %v945_v8, %v553_v60 }
 0x19b   :  { %v947_v54 = vpop.eup %946  ;;  %v482_v55 = vadd.f32 1e-06, %v1352_v50 }
 0x19c   :  { %v1354_v51 = vpop.f32.mrf.mxu1  ;;  %616 = vrot.lane.b32.xlu1 %v576_v52, %s1055_s14  ;;  %v545_v56 = vmul.f32 %v947_v54, %v481_v47 }
 0x19d   :  { %v949_v57 = vpop.eup %948  ;;  %950 = vrcp.f32 %v482_v55  ;;  %v475_v58 = vadd.f32 1e-06, %v1354_v51 }
 0x19e   :  { %v561_v59 = vsub.f32 2.0, %v545_v56  ;;  %v538_v2 = vmul.f32 %v949_v57, %v474_v7 }
 0x19f   :  { %952 = vrcp.f32 %v475_v58 }
 0x1a0   :  { %v577_v63 = vmul.f32 %v947_v54, %v561_v59  ;;  %v554_v30 = vsub.f32 2.0, %v538_v2 }
 0x1a2   :  { %v1359_v61 = vpop.f32.mrf.mxu3  ;;  %618 = vrot.lane.b32.xlu2 %v577_v63, %s1055_s14  ;;  %v570_v44 = vmul.f32 %v949_v57, %v554_v30 }
 0x1a3   :  { %v951_v19 = vpop.eup %950  ;;  %v483_v25 = vadd.f32 1e-06, %v1359_v61 }
 0x1a4   :  { %v1361_v6 = vpop.f32.mrf.mxu1  ;;  %602 = vrot.lane.b32.xlu1 %v569_v12, %s1055_s14  ;;  %v546_v36 = vmul.f32 %v951_v19, %v482_v55 }
 0x1a5   :  { %v953_v39 = vpop.eup %952  ;;  %v476_v40 = vadd.f32 1e-06, %v1361_v6  ;;  %954 = vrcp.f32 %v483_v25 }
 0x1a6   :  { %v562_v41 = vsub.f32 2.0, %v546_v36  ;;  %v539_v46 = vmul.f32 %v953_v39, %v475_v58 }
 0x1a7   :  { %956 = vrcp.f32 %v476_v40 }
 0x1a8   :  { %v578_v47 = vmul.f32 %v951_v19, %v562_v41  ;;  %v555_v49 = vsub.f32 2.0, %v539_v46 }
 0x1aa   :  { %v1367_v42 = vpop.f32.mrf.mxu3  ;;  %604 = vrot.lane.b32.xlu2 %v570_v44, %s1055_s14  ;;  %v571_v55 = vmul.f32 %v953_v39, %v555_v49 }
 0x1ab   :  { %v484_v48 = vadd.f32 1e-06, %v1367_v42  ;;  %v955_v7 = vpop.eup %954 }
 0x1ac   :  { %v1369_v3 = vpop.f32.mrf.mxu1  ;;  %620 = vrot.lane.b32.xlu1 %v578_v47, %s1055_s14  ;;  %v547_v57 = vmul.f32 %v955_v7, %v483_v25 }
 0x1ad   :  { %v957_v8 = vpop.eup %956  ;;  %958 = vrcp.f32 %v484_v48  ;;  %v477_v52 = vadd.f32 1e-06, %v1369_v3 }
 0x1ae   :  { %v540_v53 = vmul.f32 %v957_v8, %v476_v40  ;;  %v563_v2 = vsub.f32 2.0, %v547_v57  ;;  %v1393_v57 = vpop.permute.xlu1 %770 }
 0x1af   :  { %960 = vrcp.f32 %v477_v52 }
 0x1b0   :  { %v556_v56 = vsub.f32 2.0, %v540_v53  ;;  %v579_v25 = vmul.f32 %v955_v7, %v563_v2 }
 0x1b2   :  { %v1375_v54 = vpop.f32.mrf.mxu3  ;;  %606 = vrot.lane.b32.xlu2 %v571_v55, %s1055_s14  ;;  %v572_v59 = vmul.f32 %v957_v8, %v556_v56 }
 0x1b3   :  { %v959_v60 = vpop.eup %958  ;;  %v485_v63 = vadd.f32 1e-06, %v1375_v54 }
 0x1b4   :  { %v1377_v58 = vpop.f32.mrf.mxu1  ;;  %608 = vrot.lane.b32.xlu1 %v572_v59, %s1055_s14  ;;  %v548_v12 = vmul.f32 %v959_v60, %v484_v48 }
 0x1b5   :  { %v961_v19 = vpop.eup %960  ;;  %v478_v30 = vadd.f32 1e-06, %v1377_v58  ;;  %962 = vrcp.f32 %v485_v63 }
 0x1b6   :  { %v564_v36 = vsub.f32 2.0, %v548_v12  ;;  %v541_v40 = vmul.f32 %v961_v19, %v477_v52 }
 0x1b7   :  { %964 = vrcp.f32 %v478_v30 }
 0x1b8   :  { %v580_v44 = vmul.f32 %v959_v60, %v564_v36  ;;  %v557_v48 = vsub.f32 2.0, %v541_v40 }
 0x1ba   :  { %v1383_v39 = vpop.f32.mrf.mxu3  ;;  %622 = vrot.lane.b32.xlu2 %v579_v25, %s1055_s14  ;;  %v573_v55 = vmul.f32 %v961_v19, %v557_v48  ;;  %v1399_v48 = vpop.permute.xlu1 %780 }
 0x1bb   :  { %v486_v46 = vadd.f32 1e-06, %v1383_v39  ;;  %v963_v47 = vpop.eup %962 }
 0x1bc   :  { %v1385_v41 = vpop.f32.mrf.mxu1  ;;  %624 = vrot.lane.b32.xlu1 %v580_v44, %s1055_s14  ;;  %v549_v52 = vmul.f32 %v963_v47, %v485_v63 }
 0x1bd   :  { %v965_v49 = vpop.eup %964  ;;  %966 = vrcp.f32 %v486_v46  ;;  %v479_v8 = vadd.f32 1e-06, %v1385_v41 }
 0x1be   :  { %v542_v53 = vmul.f32 %v965_v49, %v478_v30  ;;  %v565_v12 = vsub.f32 2.0, %v549_v52 }
 0x1bf   :  { %968 = vrcp.f32 %v479_v8 }
 0x1c0   :  { %v558_v7 = vsub.f32 2.0, %v542_v53  ;;  %v581_v19 = vmul.f32 %v963_v47, %v565_v12  ;;  %v1401_v53 = vpop.permute.xlu2 %775  ;;  %v488_v12 = vld [vmem:[%s1534_s2] sm:$0xff] }
 0x1c2   :  { %v1391_v56 = vpop.f32.mrf.mxu3  ;;  %610 = vrot.lane.b32.xlu2 %v573_v55, %s1055_s14  ;;  %v574_v59 = vmul.f32 %v965_v49, %v558_v7  ;;  %v1405_v52 = vpop.permute.xlu1 %790 }
 0x1c3   :  { %v967_v60 = vpop.eup %966  ;;  %v487_v2 = vadd.f32 1e-06, %v1391_v56 }
 0x1c4   :  { %612 = vrot.lane.b32.xlu1 %v574_v59, %s1055_s14  ;;  %v550_v36 = vmul.f32 %v967_v60, %v486_v46 }
 0x1c5   :  { %v969_v25 = vpop.eup %968  ;;  %970 = vrcp.f32 %v487_v2 }
 0x1c6   :  { %v566_v30 = vsub.f32 2.0, %v550_v36  ;;  %v543_v40 = vmul.f32 %v969_v25, %v479_v8 }
 0x1c8   :  { %v582_v63 = vmul.f32 %v967_v60, %v566_v30  ;;  %v559_v49 = vsub.f32 2.0, %v543_v40  ;;  %v1407_v47 = vpop.permute.xlu2 %785 }
 0x1ca   :  { %626 = vrot.lane.b32.xlu2 %v581_v19, %s1055_s14  ;;  %v575_v7 = vmul.f32 %v969_v25, %v559_v49  ;;  %v1410_v59 = vpop.permute.xlu1 %800 }
 0x1cb   :  { %v971_v44 = vpop.eup %970 }
 0x1cc   :  { %628 = vrot.lane.b32.xlu1 %v582_v63, %s1055_s14  ;;  %v551_v55 = vmul.f32 %v971_v44, %v487_v2  ;;  %v504_v2 = vmax.f32 %v488_v12, 0.0 }
 0x1ce   :  { %v567_v46 = vsub.f32 2.0, %v551_v55  ;;  %765 = vperm.xlu0 %935, %v504_v2  }
 0x1d0   :  { %v583_v8 = vmul.f32 %v971_v44, %v567_v46  ;;  %v1412_v60 = vpop.permute.xlu2 %795 }
 0x1d2   :  { %614 = vrot.lane.b32.xlu2 %v575_v7, %s1055_s14  ;;  %v1417_v36 = vpop.permute.xlu1 %810 }
 0x1d8   :  { %v1419_v25 = vpop.permute.xlu2 %805 }
 0x1da   :  { %630 = vrot.lane.b32.xlu2 %v583_v8, %s1055_s14  ;;  %v1421_v30 = vpop.permute.xlu1 %820 }
 0x1e0   :  { %v1423_v19 = vpop.permute.xlu2 %815 }
 0x1e2   :  { %v1425_v40 = vpop.permute.xlu1 %830 }
 0x1e8   :  { %v1427_v63 = vpop.permute.xlu2 %825 }
 0x1fc   :  { %v619_v44 = vpop.permute.xlu2 %618 }
 0x204   :  { %v605_v8 = vpop.permute.xlu2 %604 }
 0x205   :  { %v650_v0 = vmul.f32 %v605_v8, %v506_v14 }
 0x206   :  { %v601_v49 = vpop.permute.xlu1 %600 }
 0x207   :  { %v648_v55 = vmul.f32 %v601_v49, %v504_v2  ;;  %v657_v2 = vmul.f32 %v619_v44, %v513_v20  ;;  %v502_v20 = vld [vmem:[%s1534_s2 + $0x70] sm:$0xff] }
 0x208   :  { %v518_v22 = vmax.f32 %v502_v20, 0.0 }
 0x209   :  { %669 = vperm.xlu1 %936, %v648_v55  }
 0x20c   :  { %v607_v29 = vpop.permute.xlu2 %606 }
 0x20d   :  { %v651_v13 = vmul.f32 %v607_v29, %v507_v5  ;;  %v1543_v5 = vmax.f32 %v1286_v21, 0.0 }
 0x20e   :  { %v617_v7 = vpop.permute.xlu1 %616 }
 0x20f   :  { %v656_v46 = vmul.f32 %v617_v7, %v512_v28 }
 0x211   :  { %709 = vperm.xlu1 %936, %v656_v46  }
 0x214   :  { %v623_v28 = vpop.permute.xlu2 %622 }
 0x215   :  { %v659_v14 = vmul.f32 %v623_v28, %v515_v24  ;;  %v1544_v24 = vmax.f32 %v1311_v27, 0.0  ;;  %v1546_v27 = vlaneseq }
 0x216   :  { %v603_v12 = vpop.permute.xlu1 %602 }
 0x217   :  { %v649_v15 = vmul.f32 %v603_v12, %v505_v1  ;;  %v1462_v55 = vand.u32 127, %v1546_v27 }
 0x219   :  { %679 = vperm.xlu1 %936, %v650_v0   ;;  %674 = vperm.xlu2 %937, %v649_v15   ;;  %vm666_vm0 = vcmp.eq.s32.totalorder %v1462_v55, 32 }
 0x21c   :  { %v611_v0 = vpop.permute.xlu2 %610 }
 0x21d   :  { %v653_v4 = vmul.f32 %v611_v0, %v509_v10  ;;  %v503_v10 = vld [vmem:[%s1534_s2 + $0x78] sm:$0xff]  ;;  %s1056_s2 = smov [#allocation7]  }
 0x21e   :  { %v621_v23 = vpop.permute.xlu1 %620  ;;  %v519_v21 = vmax.f32 %v503_v10, 0.0  ;;  %s879_s20 = sshll.u32 %s1056_s2, 4  ;;  %s880_s20 = int_to_ptr.vmem [resolvable:$true] %s879_s20 }
 0x21f   :  { %v658_v26 = vmul.f32 %v621_v23, %v514_v32  ;;  %v1545_v32 = vmax.f32 %v1255_v11, 0.0 }
 0x221   :  { %714 = vperm.xlu2 %937, %v657_v2   ;;  %719 = vperm.xlu1 %936, %v658_v26  }
 0x226   :  { %v609_v49 = vpop.permute.xlu1 %608 }
 0x227   :  { %v652_v62 = vmul.f32 %v609_v49, %v508_v18  ;;  %v627_v18 = vpop.permute.xlu2 %626 }
 0x228   :  { %v661_v29 = vmul.f32 %v627_v18, %v1544_v24 }
 0x229   :  { %684 = vperm.xlu2 %937, %v651_v13   ;;  %689 = vperm.xlu1 %936, %v652_v62  }
 0x22e   :  { %v625_v1 = vpop.permute.xlu1 %624 }
 0x22f   :  { %v660_v15 = vmul.f32 %v625_v1, %v516_v34  ;;  %v615_v9 = vpop.permute.xlu2 %614 }
 0x230   :  { %v655_v33 = vmul.f32 %v615_v9, %v1545_v32 }
 0x231   :  { %724 = vperm.xlu2 %937, %v659_v14   ;;  %729 = vperm.xlu1 %936, %v660_v15  }
 0x236   :  { %v613_v17 = vpop.permute.xlu1 %612 }
 0x237   :  { %v654_v16 = vmul.f32 %v613_v17, %v1543_v5  ;;  %v631_v34 = vpop.permute.xlu2 %630 }
 0x238   :  { %v663_v44 = vmul.f32 %v631_v34, %v519_v21 }
 0x239   :  { %694 = vperm.xlu2 %937, %v653_v4   ;;  %699 = vperm.xlu1 %936, %v654_v16  }
 0x23e   :  { %v629_v23 = vpop.permute.xlu1 %628 }
 0x23f   :  { %v662_v31 = vmul.f32 %v629_v23, %v518_v22 }
 0x240   :  { %v766_v11 = vpop.permute.xlu0 %765 }
 0x241   :  { %734 = vperm.xlu2 %937, %v661_v29   ;;  %739 = vperm.xlu1 %936, %v662_v31  }
 0x249   :  { %704 = vperm.xlu2 %937, %v655_v33   ;;  %840 = vperm.xlu1 %936, %v519_v21  }
 0x251   :  { %744 = vperm.xlu2 %937, %v663_v44  }
 0x259   :  { %835 = vperm.xlu2 %937, %v518_v22  }
 0x273   :  { %v675_v7 = vpop.permute.xlu2 %674 }
 0x274   :  { %v748_v46 = vmul.f32 %v675_v7, %v1341_v38 }
 0x276   :  { %v844_v8 = vsel %vm666_vm0, %v1393_v57, %v748_v46 }
 0x277   :  { %860 = vst [vmem:[#allocation7 + $0x8] sm:$0xff] %v844_v8 }
 0x27b   :  { %v715_v12 = vpop.permute.xlu2 %714  ;;  %v670_v2 = vpop.permute.xlu1 %669 }
 0x27c   :  { %v756_v26 = vmul.f32 %v715_v12, %v1345_v43  ;;  %v747_v28 = vmul.f32 %v670_v2, %v1336_v35 }
 0x27e   :  { %v852_v49 = vsel %vm666_vm0, %v1417_v36, %v756_v26  ;;  %v843_v13 = vsel %vm666_vm0, %v766_v11, %v747_v28 }
 0x27f   :  { %868 = vst [vmem:[#allocation7 + $0x48] sm:$0xff] %v852_v49 }
 0x280   :  { %859 = vst [vmem:[#allocation7] sm:$0xff] %v843_v13 }
 0x283   :  { %v685_v38 = vpop.permute.xlu2 %684  ;;  %v710_v62 = vpop.permute.xlu1 %709 }
 0x284   :  { %v750_v57 = vmul.f32 %v685_v38, %v1354_v51  ;;  %v755_v0 = vmul.f32 %v710_v62, %v1339_v37 }
 0x286   :  { %v846_v43 = vsel %vm666_vm0, %v1399_v48, %v750_v57  ;;  %v851_v35 = vsel %vm666_vm0, %v1419_v25, %v755_v0 }
 0x287   :  { %862 = vst [vmem:[#allocation7 + $0x18] sm:$0xff] %v846_v43 }
 0x288   :  { %867 = vst [vmem:[#allocation7 + $0x40] sm:$0xff] %v851_v35 }
 0x28b   :  { %v725_v36 = vpop.permute.xlu2 %724  ;;  %v680_v1 = vpop.permute.xlu1 %679 }
 0x28c   :  { %v758_v14 = vmul.f32 %v725_v36, %v1359_v61  ;;  %v749_v15 = vmul.f32 %v680_v1, %v1347_v45 }
 0x28e   :  { %v854_v37 = vsel %vm666_vm0, %v1421_v30, %v758_v14  ;;  %v845_v51 = vsel %vm666_vm0, %v1401_v53, %v749_v15 }
 0x28f   :  { %870 = vst [vmem:[#allocation7 + $0x58] sm:$0xff] %v854_v37 }
 0x290   :  { %861 = vst [vmem:[#allocation7 + $0x10] sm:$0xff] %v845_v51 }
 0x293   :  { %v695_v48 = vpop.permute.xlu2 %694  ;;  %v720_v25 = vpop.permute.xlu1 %719 }
 0x294   :  { %v752_v17 = vmul.f32 %v695_v48, %v1369_v3  ;;  %v757_v4 = vmul.f32 %v720_v25, %v1352_v50 }
 0x296   :  { %v848_v45 = vsel %vm666_vm0, %v1405_v52, %v752_v17  ;;  %v853_v61 = vsel %vm666_vm0, %v1423_v19, %v757_v4 }
 0x297   :  { %864 = vst [vmem:[#allocation7 + $0x28] sm:$0xff] %v848_v45 }
 0x298   :  { %869 = vst [vmem:[#allocation7 + $0x50] sm:$0xff] %v853_v61 }
 0x29b   :  { %v735_v30 = vpop.permute.xlu2 %734  ;;  %v690_v53 = vpop.permute.xlu1 %689 }
 0x29c   :  { %v760_v5 = vmul.f32 %v735_v30, %v1375_v54  ;;  %v751_v16 = vmul.f32 %v690_v53, %v1361_v6 }
 0x29e   :  { %v856_v50 = vsel %vm666_vm0, %v1425_v40, %v760_v5  ;;  %v847_v3 = vsel %vm666_vm0, %v1407_v47, %v751_v16 }
 0x29f   :  { %872 = vst [vmem:[#allocation7 + $0x68] sm:$0xff] %v856_v50 }
 0x2a0   :  { %863 = vst [vmem:[#allocation7 + $0x20] sm:$0xff] %v847_v3 }
 0x2a3   :  { %v705_v52 = vpop.permute.xlu2 %704  ;;  %v730_v19 = vpop.permute.xlu1 %729 }
 0x2a4   :  { %v754_v18 = vmul.f32 %v705_v52, %v1385_v41  ;;  %v759_v20 = vmul.f32 %v730_v19, %v1367_v42 }
 0x2a6   :  { %v850_v6 = vsel %vm666_vm0, %v1410_v59, %v754_v18  ;;  %v855_v54 = vsel %vm666_vm0, %v1427_v63, %v759_v20 }
 0x2a7   :  { %866 = vst [vmem:[#allocation7 + $0x38] sm:$0xff] %v850_v6 }
 0x2a8   :  { %871 = vst [vmem:[#allocation7 + $0x60] sm:$0xff] %v855_v54 }
 0x2ab   :  { %v745_v40 = vpop.permute.xlu2 %744  ;;  %v700_v47 = vpop.permute.xlu1 %699 }
 0x2ac   :  { %v753_v22 = vmul.f32 %v700_v47, %v1377_v58  ;;  %v762_v58 = vmul.f32 %v745_v40, %v1391_v56 }
 0x2ae   :  { %v849_v41 = vsel %vm666_vm0, %v1412_v60, %v753_v22 }
 0x2af   :  { %865 = vst [vmem:[#allocation7 + $0x30] sm:$0xff] %v849_v41 }
 0x2b3   :  { %v740_v42 = vpop.permute.xlu1 %739  ;;  %v836_v24 = vpop.permute.xlu2 %835 }
 0x2b4   :  { %v761_v23 = vmul.f32 %v740_v42, %v1383_v39 }
 0x2b6   :  { %v857_v59 = vsel %vm666_vm0, %v836_v24, %v761_v23 }
 0x2b7   :  { %873 = vst [vmem:[#allocation7 + $0x70] sm:$0xff] %v857_v59 }
 0x2bb   :  { %v841_v63 = vpop.permute.xlu1 %840 }
 0x2bc   :  { %v858_v60 = vsel %vm666_vm0, %v841_v63, %v762_v58 }
 0x2bd   :  { %874 = vst [vmem:[#allocation7 + $0x78] sm:$0xff] %v858_v60 }
 0x2be   :  { %887 = dma.vmem_to_hbm [thread:$0]  %s880_s20, 2048, %s882_s23, [#allocation4], %s1051_s29, %s1051_s29, %s1052_s30  }
 0x2bf   :  { %1048 = dma.done.wait [#allocation4], 2048  }
 0x2c0   :  { %1049 = vsyncadd [#allocation4], 4294965248 }
 0x2c1   :  { %892 = vsyncpa [#allocation3], 1 }
 0x2c2   :  { %893 = vsyncpa [#allocation6], 1 }
 0x2c3   :  { %894 = vsyncpa [#allocation4], 1 }

</bundles_post_ra>
